<compile_context>
chip_gen: v6e
topology: v6e:2x2x1
jax: 0.10.0
libtpu: 0.0.40
codegen_flags: <defaults>
</compile_context>

<pallas_src>
import functools
import math

import jax
import jax.numpy as jnp
from jax import lax
from jax.experimental import pallas as pl
from jax.experimental.pallas import tpu as pltpu


_VMEM_LIMIT_BYTES = 48 * 1024 * 1024            # safe on v5e/v6e (128 MiB) and v7x (64 MiB)
_TILE_BUDGET_BYTES = int(0.65 * _VMEM_LIMIT_BYTES)


def _round_up(x, m):
    return (x + m - 1) // m * m


def _divisors(n):
    return [d for d in range(1, n + 1) if n % d == 0]


# ---------------------------------------------------------------------------
# Kernel
# ---------------------------------------------------------------------------
def _cond_linear_kernel(tid_ref, x_ref, w_ref, o_ref, *, axis, bt, resident):
    """One grid step: `bt` batches of the conditional matmul.

    tid_ref: (B,) int32 scalar-prefetch ref (SMEM).
    x_ref:   axis==2 -> (bt, tn, fin) VMEM tile; axis==1 -> (bt, fin, D).
    w_ref:   resident -> full table (axis==2: (n_tasks, fin, fout_eff),
                                     axis==1: (n_tasks, fout, fin));
             else     -> per-task gathered tile (1, ...).
    o_ref:   axis==2 -> (bt, tn, fout_eff); axis==1 -> (bt, fout, D).
    """
    g = pl.program_id(0)

    def body(i, carry):
        if resident:
            w = w_ref[tid_ref[g * bt + i]]      # in-VMEM per-batch gather
        else:
            w = w_ref[0]                        # already the right task's weight
        x = x_ref[i]
        if axis == 2:
            # (tn, fin) @ (fin, fout_eff): weight pre-transposed in the wrapper,
            # so the MXU RHS is lane-dense and no per-step transpose is needed.
            y = jnp.dot(x, w, preferred_element_type=jnp.float32)
        else:
            y = jnp.dot(w, x, preferred_element_type=jnp.float32)   # (fout, D)
        o_ref[i] = y.astype(o_ref.dtype)
        return carry

    # Visible, bounded-live-range loop for the scheduler (bt is small/static).
    lax.fori_loop(0, bt, body, None, unroll=True)


# ---------------------------------------------------------------------------
# VMEM-budget-aware tile selection
# ---------------------------------------------------------------------------
def _choose_tiles_axis2(B, N, D, fout_eff, itemsize, w_footprint_bytes):
    """Pick (bt, tn) so 2x(bt*tn*D + bt*tn*fout_eff) + weight fits the budget."""
    xo_budget = max(_TILE_BUDGET_BYTES - w_footprint_bytes, 0)
    bt_cap = max(1, min(8, B // 2)) if B > 1 else 1     # >=2 grid steps on batch
    bt_cands = [d for d in _divisors(B) if d <= bt_cap]
    # Second-to-last block dim must be a multiple of 8 or the full dim.
    tn_cands = sorted({d for d in _divisors(N) if d % 8 == 0} | {N})
    best = None                                          # ((bt*tn, tn), bt, tn)
    for bt in bt_cands:
        for tn in tn_cands:
            step = 2 * bt * tn * (D + fout_eff) * itemsize   # double-buffered x+out
            if step > xo_budget:
                continue
            score = (bt * tn, tn)
            if best is None or score > best[0]:
                best = (score, bt, tn)
    if best is None:
        # Tiny budget / huge D: fall back to the smallest legal tile.
        return 1, min(tn_cands)
    return best[1], best[2]


def _choose_bt_axis1(B, N, D, fout, itemsize, w_footprint_bytes):
    xo_budget = max(_TILE_BUDGET_BYTES - w_footprint_bytes, 0)
    bt_cap = max(1, min(8, B // 2)) if B > 1 else 1
    best = 1
    for bt in (d for d in _divisors(B) if d <= bt_cap):
        step = 2 * bt * (N * D + fout * D) * itemsize
        if step <= xo_budget:
            best = max(best, bt)
    return best


# ---------------------------------------------------------------------------
# Wrapper
# ---------------------------------------------------------------------------
def conditional_linear_forward(x, task_id, weight_table, fin, fout, axis=2,
                               *, force_resident=None):
    """Pallas implementation of ConditionalLinear.forward.

    Args:
      x:            (B, N, D) float32
      task_id:      (B,) int32
      weight_table: (n_tasks, fin * fout) float32  (nn.Embedding weight)
      axis:         2 -> 'bnd,bcd->bnc' ; 1 -> 'bnd,bcn->bcd'
      force_resident: override the resident-table heuristic (testing).

    Returns:
      (out, task_id) mirroring the PyTorch module output tuple.
    """
    assert axis in (1, 2)
    B, N, D = x.shape
    n_tasks = weight_table.shape[0]
    task_id = task_id.astype(jnp.int32)
    itemsize = x.dtype.itemsize

    # Glue reshape in plain JAX, matches torch .view(-1, fout, fin).
    w3 = weight_table.reshape(n_tasks, fout, fin)

    if axis == 2:
        assert D == fin, "axis=2 requires x last dim == fin"
        # Lane-dense output: pad fout to a multiple of 128 (zero rows, sliced
        # off after the call) so stores are unmasked full-lane vst; then
        # pre-transpose once so the kernel does a plain x @ w.
        fout_eff = _round_up(fout, 128)
        if fout_eff != fout:
            w3 = jnp.pad(w3, ((0, 0), (0, fout_eff - fout), (0, 0)))
        w_call = jnp.transpose(w3, (0, 2, 1))            # (n_tasks, fin, fout_eff)
        w_block_full = (n_tasks, fin, fout_eff)
        w_block_one = (1, fin, fout_eff)
        per_task_w_bytes = fin * fout_eff * itemsize
        flops = 2 * B * N * fin * fout_eff
        out_full_shape = (B, N, fout_eff)
    else:
        assert N == fin, "axis=1 requires x middle dim == fin"
        # NOTE: output lane dim here is D (comes from x). If D < 128 the stores
        # are masked vst.msk; padding D would inflate x HBM traffic, left as-is.
        fout_eff = fout
        w_call = w3                                      # (n_tasks, fout, fin)
        w_block_full = (n_tasks, fout, fin)
        w_block_one = (1, fout, fin)
        per_task_w_bytes = fout * fin * itemsize
        flops = 2 * B * fout * N * D
        out_full_shape = (B, fout, D)

    table_bytes = n_tasks * per_task_w_bytes
    # The pipeline double-buffers every input, even one with a constant block
    # index, so a resident table costs 2x its size in VMEM.
    resident = 2 * table_bytes <= _TILE_BUDGET_BYTES // 2
    if force_resident is not None:
        resident = bool(force_resident)
    w_footprint = 2 * table_bytes if resident else 2 * per_task_w_bytes

    # --- tile selection + specs --------------------------------------------
    if axis == 2:
        if resident:
            bt, tn = _choose_tiles_axis2(B, N, D, fout_eff, itemsize, w_footprint)
        else:
            bt = 1                                       # one task's weight per step
            _, tn = _choose_tiles_axis2(1, N, D, fout_eff, itemsize, w_footprint)
        grid = (B // bt, N // tn)
        sems = ("parallel", "parallel")
        x_spec = pl.BlockSpec((bt, tn, D), lambda g, n, tid: (g, n, 0))
        out_spec = pl.BlockSpec((bt, tn, fout_eff), lambda g, n, tid: (g, n, 0))
        if resident:
            w_spec = pl.BlockSpec(w_block_full, lambda g, n, tid: (0, 0, 0))
        else:
            w_spec = pl.BlockSpec(w_block_one, lambda g, n, tid: (tid[g], 0, 0))
    else:
        if resident:
            bt = _choose_bt_axis1(B, N, D, fout, itemsize, w_footprint)
        else:
            bt = 1
        grid = (B // bt,)
        sems = ("parallel",)
        x_spec = pl.BlockSpec((bt, N, D), lambda g, tid: (g, 0, 0))
        out_spec = pl.BlockSpec((bt, fout, D), lambda g, tid: (g, 0, 0))
        if resident:
            w_spec = pl.BlockSpec(w_block_full, lambda g, tid: (0, 0, 0))
        else:
            w_spec = pl.BlockSpec(w_block_one, lambda g, tid: (tid[g], 0, 0))

    # --- non-resident path: sort batches by task so consecutive grid steps
    # share a weight block index and Pallas skips the redundant weight DMA ---
    inv = None
    x_call, tid_call = x, task_id
    if not resident and B > 1:
        perm = jnp.argsort(task_id)
        inv = jnp.argsort(perm)
        x_call = jnp.take(x, perm, axis=0)
        tid_call = jnp.take(task_id, perm, axis=0)

    weight_traffic = table_bytes if resident else B * per_task_w_bytes
    cost = pl.CostEstimate(
        flops=int(flops),
        transcendentals=0,
        bytes_accessed=int(x.size * itemsize + weight_traffic
                           + math.prod(out_full_shape) * itemsize))

    kernel = functools.partial(
        _cond_linear_kernel, axis=axis, bt=bt, resident=resident)

    out = pl.pallas_call(
        kernel,
        out_shape=jax.ShapeDtypeStruct(out_full_shape, x.dtype),
        grid_spec=pltpu.PrefetchScalarGridSpec(
            num_scalar_prefetch=1,
            grid=grid,
            in_specs=[x_spec, w_spec],
            out_specs=out_spec,
        ),
        compiler_params=pltpu.CompilerParams(
            dimension_semantics=sems,
            vmem_limit_bytes=_VMEM_LIMIT_BYTES,
        ),
        cost_estimate=cost,
    )(tid_call, x_call, w_call)

    if inv is not None:
        out = jnp.take(out, inv, axis=0)
    if axis == 2 and fout_eff != fout:
        out = out[:, :, :fout]
    return out, task_id


# ---------------------------------------------------------------------------
# Deterministic parameter init (synthetic stand-in for get_rnd_weight)
# ---------------------------------------------------------------------------
def init_weight_table(key, n_tasks, fin, fout, nonlinearity="relu"):
    gain = jnp.sqrt(2.0) if nonlinearity == "relu" else 1.0
    std = gain / jnp.sqrt(jnp.asarray(fin, jnp.float32))
    w = jax.random.normal(key, (n_tasks, fout, fin), dtype=jnp.float32) * std
    return w.reshape(n_tasks, fout * fin)


# ---------------------------------------------------------------------------
# Main
# ---------------------------------------------------------------------------
if __name__ == "__main__":
    key = jax.random.PRNGKey(0)
    k_x, k_w, k_t = jax.random.split(key, 3)

    # Small shapes consistent with (x, task_id) forward: x is (B, N, fin)
    B, N = 2, 8
    fin, fout = 32, 16
    n_tasks = 4

    weight_table = init_weight_table(k_w, n_tasks, fin, fout, "relu")
    task_id = jax.random.randint(k_t, (B,), 0, n_tasks, dtype=jnp.int32)
    w3_gathered = weight_table.reshape(n_tasks, fout, fin)[task_id]   # (B, fout, fin)

    # ----- axis = 2 (default, resident-table fast path) -----
    x2 = jax.random.normal(k_x, (B, N, fin), dtype=jnp.float32)
    out2, _ = conditional_linear_forward(x2, task_id, weight_table, fin, fout, axis=2)
    out2 = jax.block_until_ready(out2)
    ref2 = jnp.einsum("bnd,bcd->bnc", x2, w3_gathered)
    assert out2.shape == (B, N, fout)
    assert jnp.allclose(out2, ref2, atol=1e-5, rtol=1e-5)

    # ----- axis = 2, forced non-resident path (per-task gather + task sort) -----
    out2b, _ = conditional_linear_forward(x2, task_id, weight_table, fin, fout,
                                          axis=2, force_resident=False)
    out2b = jax.block_until_ready(out2b)
    assert jnp.allclose(out2b, ref2, atol=1e-5, rtol=1e-5)

    # ----- axis = 1 (requires N == fin) -----
    x1 = jax.random.normal(k_x, (B, fin, 24), dtype=jnp.float32)      # (B, N=fin, D)
    out1, _ = conditional_linear_forward(x1, task_id, weight_table, fin, fout, axis=1)
    out1 = jax.block_until_ready(out1)
    ref1 = jnp.einsum("bnd,bcn->bcd", x1, w3_gathered)
    assert out1.shape == (B, fout, 24)
    assert jnp.allclose(out1, ref1, atol=1e-5, rtol=1e-5)

    print("KERNEL_OK")
</pallas_src>

<mosaic_0001>
module attributes {stable_mosaic.version = 11 : i64} {
  func.func @_cond_linear_kernel(%arg0: i32, %arg1: i32, %arg2: memref<2xi32, #tpu.memory_space<smem>>, %arg3: memref<1x8x32xf32, #tpu.memory_space<vmem>>, %arg4: memref<4x32x128xf32, #tpu.memory_space<vmem>>, %arg5: memref<1x8x128xf32, #tpu.memory_space<vmem>>) attributes {dimension_semantics = [#tpu.dimension_semantics<parallel>, #tpu.dimension_semantics<parallel>], iteration_bounds = array<i64: 2, 1>, scalar_prefetch = 1 : i64, scratch_operands = 0 : i64, tpu.core_type = #tpu.core_type<tc>, window_params = [{transform_indices = @transform_0, window_bounds = array<i64: 1, 8, 32>}, {pipeline_mode = #tpu.pipeline_mode<synchronous>, transform_indices = @transform_1, window_bounds = array<i64: 4, 32, 128>}, {transform_indices = @transform_2, window_bounds = array<i64: 1, 8, 128>}]} {
    %c0_i32 = arith.constant 0 : i32
    %c1_i32 = arith.constant 1 : i32
    %0 = arith.muli %arg0, %c1_i32 : i32
    %1 = arith.addi %0, %c0_i32 : i32
    %2 = arith.index_cast %1 : i32 to index
    %3 = memref.load %arg2[%2] : memref<2xi32, #tpu.memory_space<smem>>
    %4 = arith.index_cast %3 : i32 to index
    %c0 = arith.constant 0 : index
    %c0_0 = arith.constant 0 : index
    %5 = vector.load %arg4[%4, %c0, %c0_0] : memref<4x32x128xf32, #tpu.memory_space<vmem>>, vector<1x32x128xf32>
    %6 = vector.shape_cast %5 : vector<1x32x128xf32> to vector<32x128xf32>
    %7 = arith.index_cast %c0_i32 : i32 to index
    %c0_1 = arith.constant 0 : index
    %c0_2 = arith.constant 0 : index
    %8 = vector.load %arg3[%7, %c0_1, %c0_2] : memref<1x8x32xf32, #tpu.memory_space<vmem>>, vector<1x8x32xf32>
    %9 = vector.shape_cast %8 : vector<1x8x32xf32> to vector<8x32xf32>
    %cst = arith.constant dense<0.000000e+00> : vector<8x128xf32>
    %10 = tpu.matmul %9, %6, %cst {dimension_numbers = #tpu.dot_dimension_numbers<[1], [0], [0], [1], [0, 0, 1, 1], [], []>} : vector<8x32xf32>, vector<32x128xf32>, vector<8x128xf32> -> vector<8x128xf32>
    %11 = arith.index_cast %c0_i32 : i32 to index
    %c0_3 = arith.constant 0 : index
    %c0_4 = arith.constant 0 : index
    %12 = vector.load %arg5[%11, %c0_3, %c0_4] : memref<1x8x128xf32, #tpu.memory_space<vmem>>, vector<1x8x128xf32>
    %13 = vector.shape_cast %12 : vector<1x8x128xf32> to vector<8x128xf32>
    %14 = vector.shape_cast %10 : vector<8x128xf32> to vector<1x8x128xf32>
    tpu.vector_store %arg5[%11, %c0_3, %c0_4], %14 {strides = array<i32>} : memref<1x8x128xf32, #tpu.memory_space<vmem>>, vector<1x8x128xf32>,
    %c1_i32_5 = arith.constant 1 : i32
    return
  }
  func.func @transform_0(%arg0: i32, %arg1: i32, %arg2: memref<2xi32, #tpu.memory_space<smem>>) -> (i32, i32, i32) {
    %c0_i32 = arith.constant 0 : i32
    %c0_i32_0 = arith.constant 0 : i32
    return %arg0, %arg1, %c0_i32 : i32, i32, i32
  }
  func.func @transform_1(%arg0: i32, %arg1: i32, %arg2: memref<2xi32, #tpu.memory_space<smem>>) -> (i32, i32, i32) {
    %c0_i32 = arith.constant 0 : i32
    %c0_i32_0 = arith.constant 0 : i32
    %c0_i32_1 = arith.constant 0 : i32
    %c0_i32_2 = arith.constant 0 : i32
    return %c0_i32, %c0_i32_0, %c0_i32_1 : i32, i32, i32
  }
  func.func @transform_2(%arg0: i32, %arg1: i32, %arg2: memref<2xi32, #tpu.memory_space<smem>>) -> (i32, i32, i32) {
    %c0_i32 = arith.constant 0 : i32
    %c0_i32_0 = arith.constant 0 : i32
    return %arg0, %arg1, %c0_i32 : i32, i32, i32
  }
}

</mosaic_0001>

<bundles_post_ra>
// kernel: tpu_custom_call.1
= control target key start
LH: loop header
LB: loop body
LE: loop exit
PB: predicated region body
PF: predicated region fallthrough
CT: control target
= control target key end

     0   :  { %s647_s12 = smov [#allocation3]   ;;  %s858_s0 = inlined_call_operand.hbm [shape: s32[2], index: 0, kind: input, shape index: {}]   ;;  %s859_s1 = inlined_call_operand.hbm [shape: f32[2,8,32], index: 1, kind: input, shape index: {}]   ;;  %s860_s2 = inlined_call_operand.hbm [shape: f32[4,32,128], index: 2, kind: input, shape index: {}]   ;;  %s861_s3 = inlined_call_operand.hbm [shape: f32[2,8,128], index: 3, kind: output, shape index: {}]  }
   0x1   :  { %9 = dma.hbm_to_smem %s858_s0, 16, %s647_s12, [#allocation2] }
   0x2   :  { %609 = dma.done.wait [#allocation2], 16 }
   0x3   :  { %610 = vsyncadd [#allocation2], 4294967280 }
   0x4   :  { %11 = sfence }
   0x5   :  { %12 = vsyncpa [#allocation5], 0 }
   0x6   :  { %14 = vsyncpa [#allocation5 + $0x1], 0 }
   0x7   :  { %15 = vsyncpa [#allocation8], 0 }
   0x8   :  { %16 = vsyncpa [#allocation6], 0 }
   0x9   :  { %18 = vsyncpa [#allocation6 + $0x1], 0  ;;  %s678_s15 = smov 0   ;;  %s680_s16 = smov 0  }
   0xa   :  { %s682_s17 = smov 0   ;;  %s684_s18 = smov 0  }
   0xb   :  { %s686_s19 = smov 0   ;;  %s688_s20 = smov 0  }
   0xc LB: > { %s386_s0 = sadd.s32 4294967295, %s645_s20   ;;  %s387_s21 = sadd.s32 4294967294, %s645_s20   ;;  %s645_s20 = sphi %s688_s20, %s24_s20   ;;  %s641_s19 = sphi %s686_s19, %s879_s19   ;;  %s637_s18 = sphi %s684_s18, %s878_s18   ;;  %s633_s17 = sphi %s682_s17, %s877_s17   ;;  %s629_s16 = sphi %s680_s16, %s876_s16   ;;  %s625_s15 = sphi %s678_s15, %s875_s15  }
   0xd   : > { %p58_p0 = scmp.ne.s32.totalorder %s629_s16, %s625_s15  ;;  %p712_p1 = scmp.eq.s32.totalorder %s386_s0, 0 }
   0xe   : > { %p716_p2 = scmp.eq.s32.totalorder %s386_s0, 1  ;;  %p111_p3 = scmp.eq.s32.totalorder %s387_s21, 1 }
   0xf   : > { %p722_p4 = por %p712_p1, %p58_p0  ;;  %p388_p5 = scmp.ge.s32.totalorder %s645_s20, 1 }
  0x10   : > { %p727_p6 = por %p111_p3, %p58_p0  ;;  %p118_p7 = scmp.lt.s32.totalorder %s645_s20, 3 }
  0x11   : > { %s865_s24 = scalar_select %p722_p4, 1, 0 }
  0x12   : > { %s866_s25 = scalar_select %p727_p6, 1, 0 }
  0x13   : > { %p732_p8 = pnand %p388_p5, %p118_p7  ;;  %s648_s27 = smov [#allocation7]  }
  0x14   : > { %s130_s28 = sshll.u32 %s648_s27, 4  ;;  %s36_s30 = sadd.s32 1, %s641_s19  ;;  %s131_s28 = int_to_ptr.vmem [resolvable:$true] %s130_s28 }
  0x15   : > { %p427_p9 = pneg %p732_p8  ;;  %s516_s4 = scalar_lea.vmem %s131_s28, 2048 }
  0x16   : > { %p517_p13 = scmp.ne.s32.totalorder %s131_s28, %s516_s4  ;;  %p524_p5 = scmp.lt.s32.totalorder %s131_s28, %s131_s28 }
  0x17   : > { %p741_p11 = pnand %p427_p9, %p712_p1  ;;  %p525_p7 = scmp.lt.s32.totalorder %s516_s4, %s516_s4 }
  0x19   : > { %p507_p12 = pneg %p741_p11  ;;  %p526_p6 = por %p525_p7, %p524_p5 }
  0x1b   : > { %p519_p0 = pnand %p517_p13, %p507_p12 }
  0x1d   : > { %p520_p3 = pneg %p519_p0 }
  0x1f   : > { %p527_p4 = pnand %p526_p6, %p520_p3 }
  0x21   : > { %530 = shalt.err (!%p527_p4)
}
  0x22   : > { %s649_s5 = smov 128   ;;  %s650_s6 = smov 8  }
  0x23   : > { %430 = dma.hbm_to_vmem [thread:$0]  (!%p741_p11), %s860_s2, 2048, %s131_s28, [#allocation8], %s649_s5, %s649_s5, %s650_s6  }
  0x24   : > { %p38_p6 = scmp.ge.s32.totalorder %s36_s30, 2  ;;  %s45_s9 = sadd.s32 1, %s633_s17 }
  0x25   : > { %p52_p4 = scmp.ne.s32.totalorder %s633_s17, %s629_s16  ;;  %p53_p9 = scmp.eq.s32.totalorder %s645_s20, 0 }
  0x26   : > { %s881_s30 = smov (%p38_p6, %s36_s30), 0  ;;  %p440_p0 = scmp.lt.s32.totalorder %s645_s20, 2 }
  0x27   : > { %p759_p12 = por %p53_p9, %p52_p4  ;;  %p765_p13 = por %p716_p2, %p52_p4 }
  0x28   : > { %s40_s12 = ssub.s32 %s641_s19, %s881_s30  ;;  %s144_s13 = sand.u32 1, %s633_s17  }
  0x29   : > { %p43_p11 = scmp.eq.s32.totalorder %s40_s12, 0  ;;  %s391_s14 = sshll.u32 %s144_s13, 3 }
  0x2a   : > { %s392_s21 = sshll.u32 %s641_s19, 7  ;;  %s148_s4 = scalar_lea.vmem [#allocation4], %s391_s14 }
  0x2b   : > { %s774_s0 = scalar_select %p43_p11, %s633_s17, %s45_s9  }
  0x2c   : > { %s154_s29 = scalar_lea.hbm %s859_s1, %s392_s21  ;;  %s156_s5 = sshll.u32 %s148_s4, 4  ;;  %s157_s5 = int_to_ptr.vmem [resolvable:$true] %s156_s5 }
  0x2d   : > { %p782_p2 = pnand %p440_p0, %p759_p12  ;;  %s145_s6 = scalar_lea.sflag [#allocation5], %s144_s13 }
  0x2e   : > { %s544_s7 = scalar_lea.vmem %s157_s5, 128  ;;  %s651_s8 = smov [#allocation4]  }
  0x2f   : > { %p533_p3 = pneg %p782_p2  ;;  %p545_p5 = scmp.ne.s32.totalorder %s157_s5, %s544_s7 }
  0x30   : > { %s549_s9 = sshll.u32 %s651_s8, 4  ;;  %s550_s9 = int_to_ptr.vmem [resolvable:$false] %s549_s9 }
  0x31   : > { %p547_p7 = pnand %p545_p5, %p533_p3  ;;  %s551_s12 = scalar_lea.vmem %s550_s9, 256 }
  0x32   : > { %p552_p4 = scmp.lt.s32.totalorder %s157_s5, %s550_s9  ;;  %p553_p9 = scmp.lt.s32.totalorder %s551_s12, %s544_s7 }
  0x33   : > { %p548_p6 = pneg %p547_p7 }
  0x34   : > { %p554_p11 = por %p553_p9, %p552_p4 }
  0x36   : > { %p555_p10 = pnand %p554_p11, %p548_p6 }
  0x38   : > { %558 = shalt.err (!%p555_p10)
}
  0x39   : > { %434 = dma.hbm_to_vmem [thread:$0]  (!%p782_p2), %s154_s29, 128, %s157_s5, %s145_s6  }
  0x3a   : > { %165 = sbr.rel (%p732_p8) target bundleno = 289 (0x121), region = 28  ;;  %s793_s10 = sand.u32 (!%p732_p8), 1, %s629_s16  }
  0x3b   : > { %s394_s13 = sshll.u32 (!%p732_p8), %s793_s10, 3  ;;  %s168_s14 = scalar_lea.sflag (!%p732_p8), [#allocation5], %s793_s10 }
  0x3c   : > { %s171_s21 = scalar_lea.vmem (!%p732_p8), [#allocation4], %s394_s13  ;;  %p872_p12 = scmp.ne.s32.totalorder (!%p732_p8), %s865_s24, 0 }
  0x3f   : > { %612 = dma.done.wait (%p872_p12), %s168_s14, 128  }
  0x40   : > { %614 = vsyncadd (%p872_p12), %s168_s14, 4294967168 }
  0x41   : > { %616 = dma.done.wait (%p712_p1), [#allocation8], 2048  }
  0x42   : > { %618 = vsyncadd (%p712_p1), [#allocation8], 4294965248  ;;  %v652_v0 = vmov 0.0   ;;  %s196_s26 = sld [smem:[#allocation3 + %s637_s18]]  ;;  %vm653_vm0 = vmmov 0   ;;  %v203_v5 = vld [vmem:[%s171_s21] sm:$0xff] }
  0x43   : > { %408 = vmatprep.subr.mxu0 %v652_v0  ;;  %416 = vmatprep.mubr.msk.f32.mxu0 %vm653_vm0, %v652_v0  ;;  %vm204_vm1 = vcmask 261120   ;;  %s195_s22 = scalar_lea.vmem [#allocation9], %s394_s13  ;;  %s400_s29 = sshll.u32 %s637_s18, 7 }
  0x44   : > { %s294_s24 = sshll.u32 %s195_s22, 4  ;;  %s812_s23 = scalar_lea.hbm %s861_s3, %s400_s29  ;;  %s807_s24 = int_to_ptr.vmem [resolvable:$true] %s294_s24 }
  0x45   : > { %s280_s6 = scalar_lea.sflag [#allocation6], %s793_s10  ;;  %s559_s7 = scalar_lea.vmem %s807_s24, 128 }
  0x46   : > { %p560_p1 = scmp.ne.s32.totalorder %s807_s24, %s559_s7  ;;  %s654_s18 = smov [#allocation9]  }
  0x47   : > { %s563_s8 = sshll.u32 %s654_s18, 4  ;;  %s564_s8 = int_to_ptr.vmem [resolvable:$false] %s563_s8 }
  0x48   : > { %s397_s27 = sshll.u32 %s196_s26, 5  ;;  %p561_p8 = pnand %p560_p1, %p765_p13 }
  0x49   : > { %s198_s28 = scalar_lea.vmem [#allocation7], %s397_s27  ;;  %s565_s9 = scalar_lea.vmem %s564_s8, 256 }
  0x4a   : > { %v202_v1 = vld [vmem:[%s198_s28 + $0x18] sm:$0xff]  ;;  %v201_v2 = vld [vmem:[%s198_s28 + $0x10] sm:$0xff]  ;;  %v200_v3 = vld [vmem:[%s198_s28 + $0x8] sm:$0xff]  ;;  %p562_p10 = pneg %p561_p8  ;;  %p566_p0 = scmp.lt.s32.totalorder %s807_s24, %s564_s8 }
  0x4b   : > { %409 = vmatpush3.msra.mxu0 %v202_v1  ;;  %v199_v4 = vld [vmem:[%s198_s28] sm:$0xff]  ;;  %p567_p2 = scmp.lt.s32.totalorder %s565_s9, %s559_s7 }
  0x4c   : > { %410 = vmatprep.subr.mxu0 %v652_v0 }
  0x4d   : > { %411 = vmatpush3.msra.mxu0 %v201_v2  ;;  %p568_p3 = por %p567_p2, %p566_p0 }
  0x4e   : > { %412 = vmatprep.subr.mxu0 %v652_v0 }
  0x4f   : > { %413 = vmatpush3.msra.mxu0 %v200_v3  ;;  %p569_p5 = pnand %p568_p3, %p562_p10 }
  0x50   : > { %414 = vmatprep.subr.mxu0 %v652_v0 }
  0x51   : > { %415 = vmatpush3.msra.mxu0 %v199_v4 }
  0x52   : > { %417 = vmatmul.mubr.msk.f32.vlgmr.msra.gmra.mxu0 %vm204_vm1, %v203_v5 }
 0x112   : > { %v274_v6 = vpop.f32.mrf.mxu0 }
 0x113   : > { %278 = vst [vmem:[%s195_s22] sm:$0xff] %v274_v6 }
 0x114   : > { %v418_v7 = vpop.f32.mrf.mxu0 }
 0x115   : > { %572 = shalt.err (!%p569_p5)
}
 0x116   : > { %s573_s12 = scalar_lea.hbm %s812_s23, 128  ;;  %s577_s14 = scalar_lea.hbm %s861_s3, 256 }
 0x117   : > { %p574_p7 = scmp.ne.s32.totalorder %s812_s23, %s573_s12  ;;  %p578_p9 = scmp.lt.s32.totalorder %s812_s23, %s861_s3 }
 0x118   : > { %p579_p11 = scmp.lt.s32.totalorder %s577_s14, %s573_s12 }
 0x119   : > { %p575_p6 = pnand %p574_p7, %p765_p13 }
 0x11a   : > { %p580_p12 = por %p579_p11, %p578_p9 }
 0x11b   : > { %p576_p4 = pneg %p575_p6 }
 0x11d   : > { %p581_p1 = pnand %p580_p12, %p576_p4 }
 0x11f   : > { %584 = shalt.err (!%p581_p1)
}
 0x120   : > { %425 = dma.vmem_to_hbm [thread:$0]  (%p765_p13), %s807_s24, 128, %s812_s23, %s280_s6  }
 0x121 PF: > { %s306_s27 = sand.u32 1, %s625_s15   ;;  %p873_p8 = scmp.ne.s32.totalorder %s866_s25, 0 }
 0x122   : > { %p874_p10 = scmp.ge.s32.totalorder %s645_s20, 2  ;;  %s307_s28 = scalar_lea.sflag [#allocation6], %s306_s27 }
 0x124   : > { %p436_p0 = pnand %p874_p10, %p873_p8 }
 0x126   : > { %p437_p2 = pneg %p436_p0 }
 0x128   : > { %620 = dma.done.wait (%p437_p2), %s307_s28, 128  }
 0x129   : > { %622 = vsyncadd (%p437_p2), %s307_s28, 4294967168  ;;  %s24_s20 = sadd.s32 1, %s645_s20   ;;  %s875_s15 = smov %s629_s16 }
 0x12a   : > { %p21_p3 = scmp.ge.s32.totalorder %s24_s20, 4   ;;  %s876_s16 = smov %s633_s17 }
 0x12b   : > { %s877_s17 = smov %s774_s0  ;;  %s878_s18 = smov %s641_s19 }
 0x12c   : > { %s879_s19 = smov %s881_s30  ;;  %23 = sbr.rel (!%p21_p3) target bundleno = 12 (0xc), region = 78 }
 0x131   :  { %312 = vsyncpa [#allocation5], 1 }
 0x132   :  { %314 = vsyncpa [#allocation5 + $0x1], 1 }
 0x133   :  { %315 = vsyncpa [#allocation8], 1 }
 0x134   :  { %316 = vsyncpa [#allocation6], 1 }
 0x135   :  { %318 = vsyncpa [#allocation6 + $0x1], 1 }

</bundles_post_ra>
